<compile_context>
chip_gen: v7x
topology: tpu7x:2x2x1
jax: 0.10.0
libtpu: 0.0.40
codegen_flags: <defaults>
</compile_context>

<pallas_src>
import functools

import jax
import jax.numpy as jnp
from jax.experimental import pallas as pl
from jax.experimental.pallas import tpu as pltpu


# ----------------------------------------------------------------------------
# Fused Pallas kernel: all `steps` iterations of edge_model + node_model
# ----------------------------------------------------------------------------
def _mpn_fused_kernel(steps,
                      gs_ref, gd_ref, x_ref, e_ref,
                      w1s_ref, w1d_ref, w1e_ref, b1_ref, w2_ref, b2_ref,
                      wm1x_ref, wm1e_ref, bm1_ref, wm2_ref, bm2_ref,
                      wnx_ref, wna_ref, bn_ref,
                      x_out_ref, e_out_ref):
    f32 = jnp.float32

    # One-hot gather/scatter matrices arrive as bf16 (exact 0/1); up-cast in-register.
    gs = gs_ref[...].astype(f32)                         # [M, N]  x[src] = gs @ x
    gd = gd_ref[...].astype(f32)                         # [M, N]  x[dst] = gd @ x

    # Loop-invariant: edge_model always consumes the ORIGINAL edge_attr, so
    # edge_attr @ W1_e + b1 is identical every step -> compute once.
    e_bias = jnp.dot(e_ref[...], w1e_ref[...], preferred_element_type=f32) + b1_ref[...]

    w1s = w1s_ref[...]; w1d = w1d_ref[...]
    w2 = w2_ref[...];   b2 = b2_ref[...]
    wm1x = wm1x_ref[...]; wm1e = wm1e_ref[...]; bm1 = bm1_ref[...]
    wm2 = wm2_ref[...];   bm2 = bm2_ref[...]
    wnx = wnx_ref[...];   wna = wna_ref[...];   bn = bn_ref[...]

    def edge_mlp(x):
        xs = jnp.dot(gs, x, preferred_element_type=f32)          # [M, D] = x[src]
        xd = jnp.dot(gd, x, preferred_element_type=f32)          # [M, D] = x[dst]
        h = jnp.maximum(jnp.dot(xs, w1s, preferred_element_type=f32)
                        + jnp.dot(xd, w1d, preferred_element_type=f32)
                        + e_bias, 0.0)
        e_new = jnp.dot(h, w2, preferred_element_type=f32) + b2  # [M, E]
        return xs, e_new

    x = x_ref[...]

    # steps-1 iterations of (edge update -> node update); `steps` is static (unrolled).
    for _ in range(steps - 1):
        xs, e_new = edge_mlp(x)
        msg = jnp.maximum(jnp.dot(xs, wm1x, preferred_element_type=f32)
                          + jnp.dot(e_new, wm1e, preferred_element_type=f32)
                          + bm1, 0.0)                                          # [M, Hn]
        msg = jnp.dot(msg, wm2, preferred_element_type=f32) + bm2              # [M, D]
        # Scatter-add to dst without materializing gd.T: contract gd's edge axis.
        agg = jax.lax.dot_general(gd, msg, (((0,), (0,)), ((), ())),
                                  preferred_element_type=f32)                  # [N, D]
        x = jnp.maximum(jnp.dot(x, wnx, preferred_element_type=f32)
                        + jnp.dot(agg, wna, preferred_element_type=f32)
                        + bn, 0.0)                                             # [N, D]

    # Final edge update (produces the returned edge_attr_mpn; x is unchanged after it).
    _, e_final = edge_mlp(x)
    x_out_ref[...] = x
    e_out_ref[...] = e_final


# ----------------------------------------------------------------------------
# MessagePassingNetworkRecurrent.forward
# ----------------------------------------------------------------------------
@functools.partial(jax.jit, static_argnames=("steps", "num_nodes"))
def mpn_recurrent_forward(x, edge_index, edge_attr, params, *, steps, num_nodes):
    src = edge_index[0]
    dst = edge_index[1]
    # Glue: one-hot gather/scatter matrices from edge_index, in bf16 (0/1 exact).
    gs = jax.nn.one_hot(src, num_nodes, dtype=jnp.bfloat16)      # [M, N]
    gd = jax.nn.one_hot(dst, num_nodes, dtype=jnp.bfloat16)      # [M, N]

    N, D = x.shape
    M, E = edge_attr.shape

    # TODO(synk): use_same_frame / same_frame_edge_model branch not instantiated
    # (disabled in this configuration, matching use_same_frame=False).
    vmem = pl.BlockSpec(memory_space=pltpu.MemorySpace.VMEM)
    x_out, e_out = pl.pallas_call(
        functools.partial(_mpn_fused_kernel, steps),
        out_shape=(jax.ShapeDtypeStruct((N, D), jnp.float32),
                   jax.ShapeDtypeStruct((M, E), jnp.float32)),
        in_specs=[vmem] * 18,
        out_specs=(vmem, vmem),
    )(gs, gd, x, edge_attr,
      params["edge_w1_src"], params["edge_w1_dst"], params["edge_w1_e"],
      params["edge_b1"], params["edge_w2"], params["edge_b2"],
      params["msg_w1_x"], params["msg_w1_e"], params["msg_b1"],
      params["msg_w2"], params["msg_b2"],
      params["node_w_x"], params["node_w_agg"], params["node_b"])
    return x_out, e_out


# ----------------------------------------------------------------------------
# Pure-JAX reference (same math) for verification
# ----------------------------------------------------------------------------
def mpn_reference(x, edge_index, edge_attr, params, *, steps, num_nodes):
    src, dst = edge_index[0], edge_index[1]
    e_mpn = edge_attr
    for step in range(steps):
        xs, xd = x[src], x[dst]
        h = jnp.maximum(
            xs @ params["edge_w1_src"] + xd @ params["edge_w1_dst"]
            + edge_attr @ params["edge_w1_e"] + params["edge_b1"], 0.0)
        e_mpn = h @ params["edge_w2"] + params["edge_b2"]
        if step == steps - 1:
            continue
        msg = jnp.maximum(
            x[src] @ params["msg_w1_x"] + e_mpn @ params["msg_w1_e"] + params["msg_b1"], 0.0)
        msg = msg @ params["msg_w2"] + params["msg_b2"]
        agg = jax.ops.segment_sum(msg, dst, num_segments=num_nodes)
        x = jnp.maximum(x @ params["node_w_x"] + agg @ params["node_w_agg"] + params["node_b"], 0.0)
    return x, e_mpn


# ----------------------------------------------------------------------------
# Deterministic parameter init
# ----------------------------------------------------------------------------
def init_params(key, node_dim, edge_dim, h_edge, h_node):
    ks = jax.random.split(key, 12)
    def w(k, shape):
        fan_in = shape[0]
        return (jax.random.normal(k, shape, jnp.float32) / jnp.sqrt(fan_in)).astype(jnp.float32)
    return {
        # edge model: Linear(2D+E -> He) [split 3 ways] + ReLU + Linear(He -> E)
        "edge_w1_src": w(ks[0], (node_dim, h_edge)),
        "edge_w1_dst": w(ks[1], (node_dim, h_edge)),
        "edge_w1_e":   w(ks[2], (edge_dim, h_edge)),
        "edge_b1":     0.01 * jnp.ones((1, h_edge), jnp.float32),
        "edge_w2":     w(ks[3], (h_edge, edge_dim)),
        "edge_b2":     0.01 * jnp.ones((1, edge_dim), jnp.float32),
        # node model: message MLP Linear(D+E -> Hn) + ReLU + Linear(Hn -> D)
        "msg_w1_x":    w(ks[4], (node_dim, h_node)),
        "msg_w1_e":    w(ks[5], (edge_dim, h_node)),
        "msg_b1":      0.01 * jnp.ones((1, h_node), jnp.float32),
        "msg_w2":      w(ks[6], (h_node, node_dim)),
        "msg_b2":      0.01 * jnp.ones((1, node_dim), jnp.float32),
        # node update: ReLU(Linear([x, agg] -> D)) [split 2 ways]
        "node_w_x":    w(ks[7], (node_dim, node_dim)),
        "node_w_agg":  w(ks[8], (node_dim, node_dim)),
        "node_b":      0.01 * jnp.ones((1, node_dim), jnp.float32),
    }


if __name__ == "__main__":
    key = jax.random.PRNGKey(0)
    k_x, k_e, k_src, k_dst, k_p = jax.random.split(key, 5)

    NUM_NODES = 16    # N
    NODE_DIM = 32     # D
    NUM_EDGES = 48    # M
    EDGE_DIM = 16     # E
    H_EDGE = 64
    H_NODE = 64
    STEPS = 3

    x = jax.random.normal(k_x, (NUM_NODES, NODE_DIM), jnp.float32)
    edge_attr = jax.random.normal(k_e, (NUM_EDGES, EDGE_DIM), jnp.float32)
    edge_index = jnp.stack([
        jax.random.randint(k_src, (NUM_EDGES,), 0, NUM_NODES),
        jax.random.randint(k_dst, (NUM_EDGES,), 0, NUM_NODES),
    ], axis=0).astype(jnp.int32)                                  # [2, M]

    params = init_params(k_p, NODE_DIM, EDGE_DIM, H_EDGE, H_NODE)

    x_out, e_out = mpn_recurrent_forward(
        x, edge_index, edge_attr, params, steps=STEPS, num_nodes=NUM_NODES)
    jax.block_until_ready((x_out, e_out))

    x_ref, e_ref = mpn_reference(
        x, edge_index, edge_attr, params, steps=STEPS, num_nodes=NUM_NODES)
    assert x_out.shape == (NUM_NODES, NODE_DIM) and e_out.shape == (NUM_EDGES, EDGE_DIM)
    assert jnp.allclose(x_out, x_ref, atol=1e-4, rtol=1e-4)
    assert jnp.allclose(e_out, e_ref, atol=1e-4, rtol=1e-4)

    print("KERNEL_OK")
</pallas_src>

<mosaic_0001>
module attributes {stable_mosaic.version = 11 : i64} {
  func.func @_mpn_fused_kernel(%arg0: memref<48x16xbf16, #tpu.memory_space<vmem>>, %arg1: memref<48x16xbf16, #tpu.memory_space<vmem>>, %arg2: memref<16x32xf32, #tpu.memory_space<vmem>>, %arg3: memref<48x16xf32, #tpu.memory_space<vmem>>, %arg4: memref<32x64xf32, #tpu.memory_space<vmem>>, %arg5: memref<32x64xf32, #tpu.memory_space<vmem>>, %arg6: memref<16x64xf32, #tpu.memory_space<vmem>>, %arg7: memref<1x64xf32, #tpu.memory_space<vmem>>, %arg8: memref<64x16xf32, #tpu.memory_space<vmem>>, %arg9: memref<1x16xf32, #tpu.memory_space<vmem>>, %arg10: memref<32x64xf32, #tpu.memory_space<vmem>>, %arg11: memref<16x64xf32, #tpu.memory_space<vmem>>, %arg12: memref<1x64xf32, #tpu.memory_space<vmem>>, %arg13: memref<64x32xf32, #tpu.memory_space<vmem>>, %arg14: memref<1x32xf32, #tpu.memory_space<vmem>>, %arg15: memref<32x32xf32, #tpu.memory_space<vmem>>, %arg16: memref<32x32xf32, #tpu.memory_space<vmem>>, %arg17: memref<1x32xf32, #tpu.memory_space<vmem>>, %arg18: memref<16x32xf32, #tpu.memory_space<vmem>>, %arg19: memref<48x16xf32, #tpu.memory_space<vmem>>) attributes {dimension_semantics = [], scalar_prefetch = 0 : i64, scratch_operands = 0 : i64, tpu.core_type = #tpu.core_type<tc>} {
    %c0 = arith.constant 0 : index
    %c0_0 = arith.constant 0 : index
    %0 = vector.load %arg0[%c0, %c0_0] : memref<48x16xbf16, #tpu.memory_space<vmem>>, vector<48x16xbf16>
    %1 = arith.extf %0 : vector<48x16xbf16> to vector<48x16xf32>
    %c0_1 = arith.constant 0 : index
    %c0_2 = arith.constant 0 : index
    %2 = vector.load %arg1[%c0_1, %c0_2] : memref<48x16xbf16, #tpu.memory_space<vmem>>, vector<48x16xbf16>
    %3 = arith.extf %2 : vector<48x16xbf16> to vector<48x16xf32>
    %c0_3 = arith.constant 0 : index
    %c0_4 = arith.constant 0 : index
    %4 = vector.load %arg3[%c0_3, %c0_4] : memref<48x16xf32, #tpu.memory_space<vmem>>, vector<48x16xf32>
    %c0_5 = arith.constant 0 : index
    %c0_6 = arith.constant 0 : index
    %5 = vector.load %arg6[%c0_5, %c0_6] : memref<16x64xf32, #tpu.memory_space<vmem>>, vector<16x64xf32>
    %cst = arith.constant dense<0.000000e+00> : vector<48x64xf32>
    %6 = tpu.matmul %4, %5, %cst {dimension_numbers = #tpu.dot_dimension_numbers<[1], [0], [0], [1], [0, 0, 1, 1], [], []>} : vector<48x16xf32>, vector<16x64xf32>, vector<48x64xf32> -> vector<48x64xf32>
    %c0_7 = arith.constant 0 : index
    %c0_8 = arith.constant 0 : index
    %7 = vector.load %arg7[%c0_7, %c0_8] : memref<1x64xf32, #tpu.memory_space<vmem>>, vector<1x64xf32>
    %8 = vector.broadcast %7 : vector<1x64xf32> to vector<48x64xf32>
    %9 = arith.addf %6, %8 : vector<48x64xf32>
    %c0_9 = arith.constant 0 : index
    %c0_10 = arith.constant 0 : index
    %10 = vector.load %arg4[%c0_9, %c0_10] : memref<32x64xf32, #tpu.memory_space<vmem>>, vector<32x64xf32>
    %c0_11 = arith.constant 0 : index
    %c0_12 = arith.constant 0 : index
    %11 = vector.load %arg5[%c0_11, %c0_12] : memref<32x64xf32, #tpu.memory_space<vmem>>, vector<32x64xf32>
    %c0_13 = arith.constant 0 : index
    %c0_14 = arith.constant 0 : index
    %12 = vector.load %arg8[%c0_13, %c0_14] : memref<64x16xf32, #tpu.memory_space<vmem>>, vector<64x16xf32>
    %c0_15 = arith.constant 0 : index
    %c0_16 = arith.constant 0 : index
    %13 = vector.load %arg9[%c0_15, %c0_16] : memref<1x16xf32, #tpu.memory_space<vmem>>, vector<1x16xf32>
    %c0_17 = arith.constant 0 : index
    %c0_18 = arith.constant 0 : index
    %14 = vector.load %arg10[%c0_17, %c0_18] : memref<32x64xf32, #tpu.memory_space<vmem>>, vector<32x64xf32>
    %c0_19 = arith.constant 0 : index
    %c0_20 = arith.constant 0 : index
    %15 = vector.load %arg11[%c0_19, %c0_20] : memref<16x64xf32, #tpu.memory_space<vmem>>, vector<16x64xf32>
    %c0_21 = arith.constant 0 : index
    %c0_22 = arith.constant 0 : index
    %16 = vector.load %arg12[%c0_21, %c0_22] : memref<1x64xf32, #tpu.memory_space<vmem>>, vector<1x64xf32>
    %c0_23 = arith.constant 0 : index
    %c0_24 = arith.constant 0 : index
    %17 = vector.load %arg13[%c0_23, %c0_24] : memref<64x32xf32, #tpu.memory_space<vmem>>, vector<64x32xf32>
    %c0_25 = arith.constant 0 : index
    %c0_26 = arith.constant 0 : index
    %18 = vector.load %arg14[%c0_25, %c0_26] : memref<1x32xf32, #tpu.memory_space<vmem>>, vector<1x32xf32>
    %c0_27 = arith.constant 0 : index
    %c0_28 = arith.constant 0 : index
    %19 = vector.load %arg15[%c0_27, %c0_28] : memref<32x32xf32, #tpu.memory_space<vmem>>, vector<32x32xf32>
    %c0_29 = arith.constant 0 : index
    %c0_30 = arith.constant 0 : index
    %20 = vector.load %arg16[%c0_29, %c0_30] : memref<32x32xf32, #tpu.memory_space<vmem>>, vector<32x32xf32>
    %c0_31 = arith.constant 0 : index
    %c0_32 = arith.constant 0 : index
    %21 = vector.load %arg17[%c0_31, %c0_32] : memref<1x32xf32, #tpu.memory_space<vmem>>, vector<1x32xf32>
    %c0_33 = arith.constant 0 : index
    %c0_34 = arith.constant 0 : index
    %22 = vector.load %arg2[%c0_33, %c0_34] : memref<16x32xf32, #tpu.memory_space<vmem>>, vector<16x32xf32>
    %cst_35 = arith.constant dense<0.000000e+00> : vector<48x32xf32>
    %23 = tpu.matmul %1, %22, %cst_35 {dimension_numbers = #tpu.dot_dimension_numbers<[1], [0], [0], [1], [0, 0, 1, 1], [], []>} : vector<48x16xf32>, vector<16x32xf32>, vector<48x32xf32> -> vector<48x32xf32>
    %cst_36 = arith.constant dense<0.000000e+00> : vector<48x32xf32>
    %24 = tpu.matmul %3, %22, %cst_36 {dimension_numbers = #tpu.dot_dimension_numbers<[1], [0], [0], [1], [0, 0, 1, 1], [], []>} : vector<48x16xf32>, vector<16x32xf32>, vector<48x32xf32> -> vector<48x32xf32>
    %cst_37 = arith.constant dense<0.000000e+00> : vector<48x64xf32>
    %25 = tpu.matmul %23, %10, %cst_37 {dimension_numbers = #tpu.dot_dimension_numbers<[1], [0], [0], [1], [0, 0, 1, 1], [], []>} : vector<48x32xf32>, vector<32x64xf32>, vector<48x64xf32> -> vector<48x64xf32>
    %cst_38 = arith.constant dense<0.000000e+00> : vector<48x64xf32>
    %26 = tpu.matmul %24, %11, %cst_38 {dimension_numbers = #tpu.dot_dimension_numbers<[1], [0], [0], [1], [0, 0, 1, 1], [], []>} : vector<48x32xf32>, vector<32x64xf32>, vector<48x64xf32> -> vector<48x64xf32>
    %27 = arith.addf %25, %26 : vector<48x64xf32>
    %28 = arith.addf %27, %9 : vector<48x64xf32>
    %cst_39 = arith.constant 0.000000e+00 : f32
    %29 = vector.broadcast %cst_39 : f32 to vector<48x64xf32>
    %30 = arith.maximumf %28, %29 : vector<48x64xf32>
    %cst_40 = arith.constant dense<0.000000e+00> : vector<48x16xf32>
    %31 = tpu.matmul %30, %12, %cst_40 {dimension_numbers = #tpu.dot_dimension_numbers<[1], [0], [0], [1], [0, 0, 1, 1], [], []>} : vector<48x64xf32>, vector<64x16xf32>, vector<48x16xf32> -> vector<48x16xf32>
    %32 = vector.broadcast %13 : vector<1x16xf32> to vector<48x16xf32>
    %33 = arith.addf %31, %32 : vector<48x16xf32>
    %cst_41 = arith.constant dense<0.000000e+00> : vector<48x64xf32>
    %34 = tpu.matmul %23, %14, %cst_41 {dimension_numbers = #tpu.dot_dimension_numbers<[1], [0], [0], [1], [0, 0, 1, 1], [], []>} : vector<48x32xf32>, vector<32x64xf32>, vector<48x64xf32> -> vector<48x64xf32>
    %cst_42 = arith.constant dense<0.000000e+00> : vector<48x64xf32>
    %35 = tpu.matmul %33, %15, %cst_42 {dimension_numbers = #tpu.dot_dimension_numbers<[1], [0], [0], [1], [0, 0, 1, 1], [], []>} : vector<48x16xf32>, vector<16x64xf32>, vector<48x64xf32> -> vector<48x64xf32>
    %36 = arith.addf %34, %35 : vector<48x64xf32>
    %37 = vector.broadcast %16 : vector<1x64xf32> to vector<48x64xf32>
    %38 = arith.addf %36, %37 : vector<48x64xf32>
    %cst_43 = arith.constant 0.000000e+00 : f32
    %39 = vector.broadcast %cst_43 : f32 to vector<48x64xf32>
    %40 = arith.maximumf %38, %39 : vector<48x64xf32>
    %cst_44 = arith.constant dense<0.000000e+00> : vector<48x32xf32>
    %41 = tpu.matmul %40, %17, %cst_44 {dimension_numbers = #tpu.dot_dimension_numbers<[1], [0], [0], [1], [0, 0, 1, 1], [], []>} : vector<48x64xf32>, vector<64x32xf32>, vector<48x32xf32> -> vector<48x32xf32>
    %42 = vector.broadcast %18 : vector<1x32xf32> to vector<48x32xf32>
    %43 = arith.addf %41, %42 : vector<48x32xf32>
    %cst_45 = arith.constant dense<0.000000e+00> : vector<16x32xf32>
    %44 = tpu.matmul %3, %43, %cst_45 {dimension_numbers = #tpu.dot_dimension_numbers<[0], [0], [1], [1], [0, 1, 1, 1], [], []>} : vector<48x16xf32>, vector<48x32xf32>, vector<16x32xf32> -> vector<16x32xf32>
    %cst_46 = arith.constant dense<0.000000e+00> : vector<16x32xf32>
    %45 = tpu.matmul %22, %19, %cst_46 {dimension_numbers = #tpu.dot_dimension_numbers<[1], [0], [0], [1], [0, 0, 1, 1], [], []>} : vector<16x32xf32>, vector<32x32xf32>, vector<16x32xf32> -> vector<16x32xf32>
    %cst_47 = arith.constant dense<0.000000e+00> : vector<16x32xf32>
    %46 = tpu.matmul %44, %20, %cst_47 {dimension_numbers = #tpu.dot_dimension_numbers<[1], [0], [0], [1], [0, 0, 1, 1], [], []>} : vector<16x32xf32>, vector<32x32xf32>, vector<16x32xf32> -> vector<16x32xf32>
    %47 = arith.addf %45, %46 : vector<16x32xf32>
    %48 = vector.broadcast %21 : vector<1x32xf32> to vector<16x32xf32>
    %49 = arith.addf %47, %48 : vector<16x32xf32>
    %cst_48 = arith.constant 0.000000e+00 : f32
    %50 = vector.broadcast %cst_48 : f32 to vector<16x32xf32>
    %51 = arith.maximumf %49, %50 : vector<16x32xf32>
    %cst_49 = arith.constant dense<0.000000e+00> : vector<48x32xf32>
    %52 = tpu.matmul %1, %51, %cst_49 {dimension_numbers = #tpu.dot_dimension_numbers<[1], [0], [0], [1], [0, 0, 1, 1], [], []>} : vector<48x16xf32>, vector<16x32xf32>, vector<48x32xf32> -> vector<48x32xf32>
    %cst_50 = arith.constant dense<0.000000e+00> : vector<48x32xf32>
    %53 = tpu.matmul %3, %51, %cst_50 {dimension_numbers = #tpu.dot_dimension_numbers<[1], [0], [0], [1], [0, 0, 1, 1], [], []>} : vector<48x16xf32>, vector<16x32xf32>, vector<48x32xf32> -> vector<48x32xf32>
    %cst_51 = arith.constant dense<0.000000e+00> : vector<48x64xf32>
    %54 = tpu.matmul %52, %10, %cst_51 {dimension_numbers = #tpu.dot_dimension_numbers<[1], [0], [0], [1], [0, 0, 1, 1], [], []>} : vector<48x32xf32>, vector<32x64xf32>, vector<48x64xf32> -> vector<48x64xf32>
    %cst_52 = arith.constant dense<0.000000e+00> : vector<48x64xf32>
    %55 = tpu.matmul %53, %11, %cst_52 {dimension_numbers = #tpu.dot_dimension_numbers<[1], [0], [0], [1], [0, 0, 1, 1], [], []>} : vector<48x32xf32>, vector<32x64xf32>, vector<48x64xf32> -> vector<48x64xf32>
    %56 = arith.addf %54, %55 : vector<48x64xf32>
    %57 = arith.addf %56, %9 : vector<48x64xf32>
    %cst_53 = arith.constant 0.000000e+00 : f32
    %58 = vector.broadcast %cst_53 : f32 to vector<48x64xf32>
    %59 = arith.maximumf %57, %58 : vector<48x64xf32>
    %cst_54 = arith.constant dense<0.000000e+00> : vector<48x16xf32>
    %60 = tpu.matmul %59, %12, %cst_54 {dimension_numbers = #tpu.dot_dimension_numbers<[1], [0], [0], [1], [0, 0, 1, 1], [], []>} : vector<48x64xf32>, vector<64x16xf32>, vector<48x16xf32> -> vector<48x16xf32>
    %61 = vector.broadcast %13 : vector<1x16xf32> to vector<48x16xf32>
    %62 = arith.addf %60, %61 : vector<48x16xf32>
    %cst_55 = arith.constant dense<0.000000e+00> : vector<48x64xf32>
    %63 = tpu.matmul %52, %14, %cst_55 {dimension_numbers = #tpu.dot_dimension_numbers<[1], [0], [0], [1], [0, 0, 1, 1], [], []>} : vector<48x32xf32>, vector<32x64xf32>, vector<48x64xf32> -> vector<48x64xf32>
    %cst_56 = arith.constant dense<0.000000e+00> : vector<48x64xf32>
    %64 = tpu.matmul %62, %15, %cst_56 {dimension_numbers = #tpu.dot_dimension_numbers<[1], [0], [0], [1], [0, 0, 1, 1], [], []>} : vector<48x16xf32>, vector<16x64xf32>, vector<48x64xf32> -> vector<48x64xf32>
    %65 = arith.addf %63, %64 : vector<48x64xf32>
    %66 = vector.broadcast %16 : vector<1x64xf32> to vector<48x64xf32>
    %67 = arith.addf %65, %66 : vector<48x64xf32>
    %cst_57 = arith.constant 0.000000e+00 : f32
    %68 = vector.broadcast %cst_57 : f32 to vector<48x64xf32>
    %69 = arith.maximumf %67, %68 : vector<48x64xf32>
    %cst_58 = arith.constant dense<0.000000e+00> : vector<48x32xf32>
    %70 = tpu.matmul %69, %17, %cst_58 {dimension_numbers = #tpu.dot_dimension_numbers<[1], [0], [0], [1], [0, 0, 1, 1], [], []>} : vector<48x64xf32>, vector<64x32xf32>, vector<48x32xf32> -> vector<48x32xf32>
    %71 = vector.broadcast %18 : vector<1x32xf32> to vector<48x32xf32>
    %72 = arith.addf %70, %71 : vector<48x32xf32>
    %cst_59 = arith.constant dense<0.000000e+00> : vector<16x32xf32>
    %73 = tpu.matmul %3, %72, %cst_59 {dimension_numbers = #tpu.dot_dimension_numbers<[0], [0], [1], [1], [0, 1, 1, 1], [], []>} : vector<48x16xf32>, vector<48x32xf32>, vector<16x32xf32> -> vector<16x32xf32>
    %cst_60 = arith.constant dense<0.000000e+00> : vector<16x32xf32>
    %74 = tpu.matmul %51, %19, %cst_60 {dimension_numbers = #tpu.dot_dimension_numbers<[1], [0], [0], [1], [0, 0, 1, 1], [], []>} : vector<16x32xf32>, vector<32x32xf32>, vector<16x32xf32> -> vector<16x32xf32>
    %cst_61 = arith.constant dense<0.000000e+00> : vector<16x32xf32>
    %75 = tpu.matmul %73, %20, %cst_61 {dimension_numbers = #tpu.dot_dimension_numbers<[1], [0], [0], [1], [0, 0, 1, 1], [], []>} : vector<16x32xf32>, vector<32x32xf32>, vector<16x32xf32> -> vector<16x32xf32>
    %76 = arith.addf %74, %75 : vector<16x32xf32>
    %77 = vector.broadcast %21 : vector<1x32xf32> to vector<16x32xf32>
    %78 = arith.addf %76, %77 : vector<16x32xf32>
    %cst_62 = arith.constant 0.000000e+00 : f32
    %79 = vector.broadcast %cst_62 : f32 to vector<16x32xf32>
    %80 = arith.maximumf %78, %79 : vector<16x32xf32>
    %cst_63 = arith.constant dense<0.000000e+00> : vector<48x32xf32>
    %81 = tpu.matmul %1, %80, %cst_63 {dimension_numbers = #tpu.dot_dimension_numbers<[1], [0], [0], [1], [0, 0, 1, 1], [], []>} : vector<48x16xf32>, vector<16x32xf32>, vector<48x32xf32> -> vector<48x32xf32>
    %cst_64 = arith.constant dense<0.000000e+00> : vector<48x32xf32>
    %82 = tpu.matmul %3, %80, %cst_64 {dimension_numbers = #tpu.dot_dimension_numbers<[1], [0], [0], [1], [0, 0, 1, 1], [], []>} : vector<48x16xf32>, vector<16x32xf32>, vector<48x32xf32> -> vector<48x32xf32>
    %cst_65 = arith.constant dense<0.000000e+00> : vector<48x64xf32>
    %83 = tpu.matmul %81, %10, %cst_65 {dimension_numbers = #tpu.dot_dimension_numbers<[1], [0], [0], [1], [0, 0, 1, 1], [], []>} : vector<48x32xf32>, vector<32x64xf32>, vector<48x64xf32> -> vector<48x64xf32>
    %cst_66 = arith.constant dense<0.000000e+00> : vector<48x64xf32>
    %84 = tpu.matmul %82, %11, %cst_66 {dimension_numbers = #tpu.dot_dimension_numbers<[1], [0], [0], [1], [0, 0, 1, 1], [], []>} : vector<48x32xf32>, vector<32x64xf32>, vector<48x64xf32> -> vector<48x64xf32>
    %85 = arith.addf %83, %84 : vector<48x64xf32>
    %86 = arith.addf %85, %9 : vector<48x64xf32>
    %cst_67 = arith.constant 0.000000e+00 : f32
    %87 = vector.broadcast %cst_67 : f32 to vector<48x64xf32>
    %88 = arith.maximumf %86, %87 : vector<48x64xf32>
    %cst_68 = arith.constant dense<0.000000e+00> : vector<48x16xf32>
    %89 = tpu.matmul %88, %12, %cst_68 {dimension_numbers = #tpu.dot_dimension_numbers<[1], [0], [0], [1], [0, 0, 1, 1], [], []>} : vector<48x64xf32>, vector<64x16xf32>, vector<48x16xf32> -> vector<48x16xf32>
    %90 = vector.broadcast %13 : vector<1x16xf32> to vector<48x16xf32>
    %91 = arith.addf %89, %90 : vector<48x16xf32>
    %c0_69 = arith.constant 0 : index
    %c0_70 = arith.constant 0 : index
    %92 = vector.load %arg18[%c0_69, %c0_70] : memref<16x32xf32, #tpu.memory_space<vmem>>, vector<16x32xf32>
    tpu.vector_store %arg18[%c0_69, %c0_70], %80 {strides = array<i32>} : memref<16x32xf32, #tpu.memory_space<vmem>>, vector<16x32xf32>,
    %c0_71 = arith.constant 0 : index
    %c0_72 = arith.constant 0 : index
    %93 = vector.load %arg19[%c0_71, %c0_72] : memref<48x16xf32, #tpu.memory_space<vmem>>, vector<48x16xf32>
    tpu.vector_store %arg19[%c0_71, %c0_72], %91 {strides = array<i32>} : memref<48x16xf32, #tpu.memory_space<vmem>>, vector<48x16xf32>,
    return
  }
}

</mosaic_0001>

<bundles_post_ra>
// kernel: mpn_recurrent_forward.1
= control target key start
LH: loop header
LB: loop body
LE: loop exit
PB: predicated region body
PF: predicated region fallthrough
CT: control target
= control target key end

     0   :  { %s5168_s0 = inlined_call_operand.vmem [shape: bf16[48,16], index: 0, kind: input, shape index: {}]   ;;  %s5169_s1 = inlined_call_operand.vmem [shape: bf16[48,16], index: 1, kind: input, shape index: {}]   ;;  %s5170_s2 = inlined_call_operand.vmem [shape: f32[16,32], index: 2, kind: input, shape index: {}]   ;;  %s5171_s3 = inlined_call_operand.vmem [shape: f32[48,16], index: 3, kind: input, shape index: {}]   ;;  %s5172_s4 = inlined_call_operand.vmem [shape: f32[32,64], index: 4, kind: input, shape index: {}]   ;;  %s5173_s5 = inlined_call_operand.vmem [shape: f32[32,64], index: 5, kind: input, shape index: {}]   ;;  %s5174_s6 = inlined_call_operand.vmem [shape: f32[16,64], index: 6, kind: input, shape index: {}]   ;;  %s5175_s7 = inlined_call_operand.vmem [shape: f32[1,64], index: 7, kind: input, shape index: {}]   ;;  %s5176_s8 = inlined_call_operand.vmem [shape: f32[64,16], index: 8, kind: input, shape index: {}]   ;;  %s5177_s9 = inlined_call_operand.vmem [shape: f32[1,16], index: 9, kind: input, shape index: {}]   ;;  %s5178_s10 = inlined_call_operand.vmem [shape: f32[32,64], index: 10, kind: input, shape index: {}]   ;;  %s5179_s11 = inlined_call_operand.vmem [shape: f32[16,64], index: 11, kind: input, shape index: {}]   ;;  %s5180_s12 = inlined_call_operand.vmem [shape: f32[1,64], index: 12, kind: input, shape index: {}]   ;;  %s5181_s13 = inlined_call_operand.vmem [shape: f32[64,32], index: 13, kind: input, shape index: {}]   ;;  %s5182_s14 = inlined_call_operand.vmem [shape: f32[1,32], index: 14, kind: input, shape index: {}]   ;;  %s5183_s15 = inlined_call_operand.vmem [shape: f32[32,32], index: 15, kind: input, shape index: {}]   ;;  %s5184_s16 = inlined_call_operand.vmem [shape: f32[32,32], index: 16, kind: input, shape index: {}]   ;;  %s5185_s17 = inlined_call_operand.vmem [shape: f32[1,32], index: 17, kind: input, shape index: {}]   ;;  %s5186_s18 = inlined_call_operand.hbm [shape: f32[16,32], index: 18, kind: output, shape index: {0}]   ;;  %s5187_s19 = inlined_call_operand.vmem [shape: f32[48,16], index: 19, kind: output, shape index: {1}]  }
   0x1   :  { %5192 = sst [smem:[#allocation5_spill]] %s5168_s0 }
   0x2   :  { %5193 = sst [smem:[#allocation6_spill]] %s5169_s1 }
   0x3   :  { %5194 = sst [smem:[#allocation7_spill]] %s5170_s2 }
   0x4   :  { %5195 = sst [smem:[#allocation8_spill]] %s5171_s3 }
   0x5   :  { %v92_v0 = vld [vmem:[%s5174_s6] sm:$0xff]  ;;  %v93_v1 = vld [vmem:[%s5174_s6 + $0x8] sm:$0xff]  ;;  %s5196_s2 = sld [smem:[#allocation8_spill]]  ;;  %vm101_vm0 = vcmask 130048   ;;  %s5197_s25 = sld [smem:[#allocation7_spill]] }
   0x6   :  { %v4050_v3 = vpack.c.bf16 %v93_v1, %v92_v0  ;;  %s5198_s28 = sld [smem:[#allocation6_spill]]  ;;  %s5199_s21 = sld [smem:[#allocation5_spill]] }
   0x8   :  { %4051 = vmatprep.subr.bf16.mxu0 %v4050_v3 }
   0x9   :  { %4053 = vmatpush3.bf16.msra.mxu0 %v4050_v3 }
   0xb   :  { %v86_v2 = vld [vmem:[%s5196_s2] sm:$0xff]  ;;  %v4469_v5 = vld [vmem:[%s5197_s25 + $0x8] sm:$0xff]  ;;  %v88_v12 = vld [vmem:[%s5196_s2 + $0x10] sm:$0xff] }
   0xc   :  { %3602 = vmatprep.mubr.msk.f32.mxu0 %vm101_vm0, %v86_v2  ;;  %v4464_v4 = vld [vmem:[%s5197_s25] sm:$0xff]  ;;  %v87_v8 = vld [vmem:[%s5196_s2 + $0x8] sm:$0xff] }
   0xd   :  { %v4054_v6 = vpack.c.bf16 %v4469_v5, %v4464_v4  ;;  %v3321_v7 = vld [vmem:[%s5198_s28] sm:$0xff]   ;;  %v3332_v11 = vld [vmem:[%s5199_s21 + $0x8] sm:$0xff]  }
   0xe   :  { %v4479_v9 = vunpack.c.l.bf16 %v3321_v7  ;;  %v3309_v10 = vld [vmem:[%s5199_s21] sm:$0xff]  }
   0xf   :  { %4055 = vmatprep.subr.bf16.mxu1 %v4054_v6  ;;  %4059 = vmatprep.subr.bf16.mxu0 %v4054_v6  ;;  %v4490_v13 = vunpack.c.l.bf16 %v3309_v10  ;;  %v4492_v14 = vunpack.c.h.bf16 %v3309_v10 }
  0x10   :  { %4057 = vmatpush3.bf16.msra.mxu1 %v4054_v6 }
  0x11   :  { %25 = vsyncpa [#allocation3], 0  ;;  %v4494_v15 = vunpack.c.l.bf16 %v3332_v11  ;;  %1189 = vxpose.xlu0.b32.start [1/6] (short) (narrow) %v4479_v9, 16  ;;  %3603 = vmatmul.mubr.msk.f32.vlgmr.msra.gmra.mrb[0].mxu0 %vm101_vm0, %v87_v8  ;;  %v3333_v16 = vld [vmem:[%s5199_s21 + $0x10] sm:$0xff]   ;;  %v89_v17 = vld [vmem:[%s5196_s2 + $0x18] sm:$0xff]  ;;  %v4507_v18 = vunpack.c.h.bf16 %v3321_v7  ;;  %v4517_v21 = vunpack.c.h.bf16 %v3332_v11  ;;  %vm485_vm1 = vcmask 261120  }
  0x12   :  { %3615 = vmatprep.mubr.msk.f32.mxu1 %vm101_vm0, %v4490_v13  ;;  %4061 = vmatpush3.bf16.msra.mxu0 %v4054_v6  ;;  %v90_v19 = vld [vmem:[%s5196_s2 + $0x20] sm:$0xff]  ;;  %v3334_v20 = vld [vmem:[%s5198_s28 + $0x8] sm:$0xff]   ;;  %v4521_v22 = vunpack.c.l.bf16 %v3333_v16  ;;  %v4533_v25 = vunpack.c.h.bf16 %v3333_v16  ;;  %v3335_v27 = vld [vmem:[%s5198_s28 + $0x10] sm:$0xff]   ;;  %vm730_vm2 = vcmask 523264   ;;  %vm1221_vm3 = vcmask 392192  }
  0x13   :  { %3605 = vmatprep.mubr.msk.f32.mxu0 %vm101_vm0, %v88_v12  ;;  %3616 = vmatmul.mubr.msk.f32.vlgmr.msra.gmra.mrb[0].mxu1 %vm101_vm0, %v4492_v14  ;;  %v91_v23 = vld [vmem:[%s5196_s2 + $0x28] sm:$0xff]  ;;  %v4529_v24 = vunpack.c.l.bf16 %v3334_v20  ;;  %v4541_v26 = vunpack.c.h.bf16 %v3334_v20  ;;  %v4553_v28 = vunpack.c.l.bf16 %v3335_v27  ;;  %v4558_v29 = vunpack.c.h.bf16 %v3335_v27  ;;  %v219_v30 = vld [vmem:[%s5173_s5] sm:$0xff]  ;;  %v221_v33 = vld [vmem:[%s5173_s5 + $0x10] sm:$0xff] }
  0x14   :  { %3618 = vmatprep.mubr.msk.f32.mxu1 %vm101_vm0, %v4494_v15  ;;  %v220_v31 = vld [vmem:[%s5173_s5 + $0x8] sm:$0xff]  ;;  %v222_v34 = vld [vmem:[%s5173_s5 + $0x18] sm:$0xff]  ;;  %v215_v36 = vld [vmem:[%s5172_s4] sm:$0xff] }
  0x15   :  { %1190 = vxpose.xlu0.b32.cont [2/6] (short) (narrow) %v4507_v18, 16  ;;  %3606 = vmatmul.mubr.msk.f32.gmra.mrb[2].mxu0 %vm101_vm0, %v89_v17  ;;  %v4571_v32 = vpack.c.bf16 %v220_v31, %v219_v30  ;;  %v4581_v35 = vpack.c.bf16 %v222_v34, %v221_v33  ;;  %v216_v37 = vld [vmem:[%s5172_s4 + $0x8] sm:$0xff]  ;;  %v223_v39 = vld [vmem:[%s5176_s8] sm:$0xff]  ;;  %v225_v41 = vld [vmem:[%s5176_s8 + $0x10] sm:$0xff] }
  0x16   :  { %3608 = vmatprep.mubr.msk.f32.mxu0 %vm101_vm0, %v90_v19  ;;  %v4591_v38 = vpack.c.bf16 %v216_v37, %v215_v36  ;;  %v224_v40 = vld [vmem:[%s5176_s8 + $0x8] sm:$0xff]  ;;  %v226_v43 = vld [vmem:[%s5176_s8 + $0x18] sm:$0xff]  ;;  %v227_v45 = vld [vmem:[%s5176_s8 + $0x20] sm:$0xff] }
  0x17   :  { %3619 = vmatmul.mubr.msk.f32.gmra.mrb[2].mxu1 %vm101_vm0, %v4517_v21  ;;  %4063 = vmatprep.subr.bf16.mxu1 %v4571_v32  ;;  %v4603_v42 = vpack.c.bf16 %v224_v40, %v223_v39  ;;  %v4608_v44 = vpack.c.bf16 %v226_v43, %v225_v41  ;;  %v228_v46 = vld [vmem:[%s5176_s8 + $0x28] sm:$0xff]  ;;  %v217_v58 = vld [vmem:[%s5172_s4 + $0x10] sm:$0xff]  ;;  %v218_v59 = vld [vmem:[%s5172_s4 + $0x18] sm:$0xff] }
  0x18   :  { %3621 = vmatprep.mubr.msk.f32.mxu1 %vm101_vm0, %v4521_v22  ;;  %4065 = vmatpush3.bf16.msra.mxu1 %v4571_v32  ;;  %v4619_v47 = vpack.c.bf16 %v228_v46, %v227_v45  ;;  %v4642_v0 = vpack.c.bf16 %v218_v59, %v217_v58  ;;  %v229_v7 = vld [vmem:[%s5176_s8 + $0x30] sm:$0xff]  ;;  %v230_v8 = vld [vmem:[%s5176_s8 + $0x38] sm:$0xff]  ;;  %v236_v11 = vld [vmem:[%s5179_s11] sm:$0xff] }
  0x19   :  { %1191 = vxpose.xlu0.b32.cont [3/6] (short) (narrow) %v4529_v24, 16  ;;  %3609 = vmatmul.mubr.msk.f32.gmra.mrb[4].mxu0 %vm101_vm0, %v91_v23  ;;  %v4671_v10 = vpack.c.bf16 %v230_v8, %v229_v7  ;;  %v237_v12 = vld [vmem:[%s5179_s11 + $0x8] sm:$0xff]  ;;  %v3159_v17 = vld [vmem:[%s5175_s7] ss:$0 sm:$0xff]  ;;  %v242_v8 = vld [vmem:[%s5181_s13 + $0x18] sm:$0xff] }
  0x1a   :  { %3628 = vmatprep.mubr.msk.f32.mxu0 %vm101_vm0, %v4479_v9  ;;  %4067 = vmatprep.subr.bf16.mxu1 %v4581_v35  ;;  %v4681_v16 = vpack.c.bf16 %v237_v12, %v236_v11  ;;  %v243_v12 = vld [vmem:[%s5181_s13 + $0x20] sm:$0xff] }
  0x1b   :  { %3622 = vmatmul.mubr.msk.f32.gmra.mrb[4].mxu1 %vm101_vm0, %v4533_v25  ;;  %4079 = vmatprep.subr.bf16.mxu0 %v4603_v42 }
  0x1c   :  { %4069 = vmatpush3.bf16.msra.mxu1 %v4581_v35 }
  0x1d   :  { %1192 = vxpose.xlu0.b32.cont [4/6] (short) (narrow) %v4541_v26, 16  ;;  %3629 = vmatmul.mubr.msk.f32.vlgmr.msra.gmra.mrb[6].mxu0 %vm101_vm0, %v4507_v18 }
  0x1e   :  { %3631 = vmatprep.mubr.msk.f32.mxu0 %vm101_vm0, %v4529_v24  ;;  %4071 = vmatprep.subr.bf16.mxu1 %v4591_v38 }
  0x1f   :  { %4081 = vmatpush3.bf16.msra.mxu0 %v4603_v42 }
  0x20   :  { %4083 = vmatprep.subr.bf16.mxu0 %v4608_v44 }
  0x21   :  { %1193 = vxpose.xlu0.b32.cont [5/6] (short) (narrow) %v4553_v28, 16  ;;  %3632 = vmatmul.mubr.msk.f32.gmra.mrb[8].mxu0 %vm101_vm0, %v4541_v26 }
  0x22   :  { %3634 = vmatprep.mubr.msk.f32.mxu0 %vm101_vm0, %v4553_v28 }
  0x23   :  { %4085 = vmatpush3.bf16.msra.mxu0 %v4608_v44 }
  0x24   :  { %4087 = vmatprep.subr.bf16.mxu0 %v4619_v47 }
  0x25   :  { %1194 = vxpose.xlu0.b32.end [6/6] (short) (narrow) %v4558_v29, 16  ;;  %3635 = vmatmul.mubr.msk.f32.gmra.mrb[10].mxu0 %vm101_vm0, %v4558_v29 }
  0x27   :  { %4089 = vmatpush3.bf16.msra.mxu0 %v4619_v47 }
  0x28   :  { %4091 = vmatprep.subr.bf16.mxu0 %v4671_v10 }
  0x2b   :  { %4093 = vmatpush3.bf16.msra.mxu0 %v4671_v10 }
  0xe4   :  { %v3604_v48 = vpop.f32.mrb[0].mxu0 }
  0xe5   :  { %v186_v49 = vpop.f32.mrb[1].mxu0  ;;  %v4688_v19 = vadd.f32 %v3604_v48, %v3159_v17 }
  0xe6   :  { %v4624_v50 = vpop.f32.mrb[0].mxu1  ;;  %v4690_v20 = vadd.f32 %v3159_v17, %v186_v49 }
  0xe7   :  { %v4626_v51 = vpop.f32.mrb[1].mxu1 }
  0xe8   :  { %v3607_v52 = vpop.f32.mrb[2].mxu0 }
  0xe9   :  { %v196_v53 = vpop.f32.mrb[3].mxu0  ;;  %v4694_v33 = vadd.f32 %v3607_v52, %v3159_v17 }
  0xea   :  { %v4628_v54 = vpop.f32.mrb[2].mxu1  ;;  %v4696_v34 = vadd.f32 %v3159_v17, %v196_v53 }
  0xeb   :  { %v4630_v55 = vpop.f32.mrb[3].mxu1 }
  0xec   :  { %v3610_v56 = vpop.f32.mrb[4].mxu0 }
  0xed   :  { %v206_v57 = vpop.f32.mrb[5].mxu0  ;;  %v4701_v45 = vadd.f32 %v3610_v56, %v3159_v17  ;;  %v232_v56 = vld [vmem:[%s5178_s10] sm:$0xff] }
  0xee   :  { %v4638_v60 = vpop.f32.mrb[4].mxu1  ;;  %v4704_v46 = vadd.f32 %v3159_v17, %v206_v57  ;;  %v233_v57 = vld [vmem:[%s5178_s10 + $0x8] sm:$0xff] }
  0xef   :  { %v4640_v61 = vpop.f32.mrb[5].mxu1  ;;  %v244_v17 = vld [vmem:[%s5181_s13 + $0x28] sm:$0xff] }
  0xf0   :  { %v3630_v62 = vpop.f32.mrb[6].mxu0 }
  0xf1   :  { %v456_v63 = vpop.f32.mrb[7].mxu0 }
  0xf2   :  { %3645 = vmatprep.mubr.msk.f32.mxu1 %vm485_vm1, %v456_v63 }
  0xf3   :  { %3646 = vmatmul.mubr.msk.f32.vlgmr.msra.gmra.mrb[6].mxu1 %vm485_vm1, %v3630_v62 }
  0xf4   :  { %v3633_v1 = vpop.f32.mrb[8].mxu0  ;;  %4073 = vmatpush3.bf16.msra.mxu1 %v4591_v38 }
  0xf5   :  { %v466_v2 = vpop.f32.mrb[9].mxu0  ;;  %4075 = vmatprep.subr.bf16.mxu1 %v4642_v0 }
  0xf6   :  { %3648 = vmatprep.mubr.msk.f32.mxu1 %vm485_vm1, %v466_v2  ;;  %v239_v2 = vld [vmem:[%s5181_s13] sm:$0xff] }
  0xf7   :  { %3649 = vmatmul.mubr.msk.f32.gmra.mrb[8].mxu1 %vm485_vm1, %v3633_v1  ;;  %v4718_v1 = vpack.c.bf16 %v233_v57, %v232_v56 }
  0xf8   :  { %v3636_v3 = vpop.f32.mrb[10].mxu0  ;;  %4077 = vmatpush3.bf16.msra.mxu1 %v4642_v0 }
  0xf9   :  { %v476_v6 = vpop.f32.mrb[11].mxu0  ;;  %4095 = vmatprep.subr.bf16.mxu1 %v4681_v16 }
  0xfa   :  { %3651 = vmatprep.mubr.msk.f32.mxu1 %vm485_vm1, %v476_v6  ;;  %v241_v6 = vld [vmem:[%s5181_s13 + $0x10] sm:$0xff] }
  0xfb   :  { %3652 = vmatmul.mubr.msk.f32.gmra.mrb[10].mxu1 %vm485_vm1, %v3636_v3  ;;  %v240_v3 = vld [vmem:[%s5181_s13 + $0x8] sm:$0xff]  ;;  %v4735_v11 = vpack.c.bf16 %v242_v8, %v241_v6 }
  0xfc   :  { %3662 = vmatprep.mubr.msk.f32.mxu1 %vm485_vm1, %v4626_v51  ;;  %v4730_v7 = vpack.c.bf16 %v240_v3, %v239_v2 }
  0xfe   :  { %4107 = vmatprep.subr.bf16.mxu0 %v4730_v7 }
  0xff   :  { %3663 = vmatmul.mubr.msk.f32.vlgmr.msra.gmra.mrb[6].mxu1 %vm485_vm1, %v4624_v50 }
 0x100   :  { %3665 = vmatprep.mubr.msk.f32.mxu1 %vm485_vm1, %v4630_v55  ;;  %4097 = vmatpush3.bf16.msra.mxu1 %v4681_v16 }
 0x101   :  { %4099 = vmatprep.subr.bf16.mxu1 %v4718_v1 }
 0x103   :  { %3666 = vmatmul.mubr.msk.f32.gmra.mrb[8].mxu1 %vm485_vm1, %v4628_v54 }
 0x104   :  { %3668 = vmatprep.mubr.msk.f32.mxu1 %vm485_vm1, %v4640_v61 }
 0x107   :  { %3669 = vmatmul.mubr.msk.f32.gmra.mrb[10].mxu1 %vm485_vm1, %v4638_v60 }
 0x1d2   :  { %v3664_v23 = vpop.f32.mrb[6].mxu1 }
 0x1d3   :  { %v713_v27 = vadd.f32 %v3664_v23, %v4688_v19  ;;  %v683_v30 = vpop.f32.mrb[7].mxu1  ;;  %v4746_v23 = vpack.c.bf16 %v244_v17, %v243_v12 }
 0x1d4   :  { %v712_v31 = vadd.f32 %v683_v30, %v4690_v20 }
 0x1d5   :  { %v719_v39 = vmax.f32 %v713_v27, 0.0  ;;  %v4754_v27 = vld [vmem:[%s5177_s9] ss:$0 sm:$0xff] }
 0x1d6   :  { %v718_v36 = vmax.f32 %v712_v31, 0.0  ;;  %v3667_v37 = vpop.f32.mrb[8].mxu1  ;;  %v234_v31 = vld [vmem:[%s5178_s10 + $0x10] sm:$0xff] }
 0x1d7   :  { %v715_v40 = vadd.f32 %v3667_v37, %v4694_v33  ;;  %v693_v41 = vpop.f32.mrb[9].mxu1 }
 0x1d8   :  { %v714_v43 = vadd.f32 %v693_v41, %v4696_v34  ;;  %3687 = vmatprep.mubr.msk.f32.mxu0 %vm730_vm2, %v718_v36  ;;  %v235_v36 = vld [vmem:[%s5178_s10 + $0x18] sm:$0xff] }
 0x1d9   :  { %3688 = vmatmul.mubr.msk.f32.vlgmr.msra.gmra.mrb[12].mxu0 %vm730_vm2, %v719_v39  ;;  %v721_v52 = vmax.f32 %v715_v40, 0.0  ;;  %v4764_v41 = vpack.c.bf16 %v235_v36, %v234_v31 }
 0x1da   :  { %v720_v48 = vmax.f32 %v714_v43, 0.0  ;;  %v3670_v49 = vpop.f32.mrb[10].mxu1  ;;  %4109 = vmatpush3.bf16.msra.mxu0 %v4730_v7 }
 0x1db   :  { %v717_v53 = vadd.f32 %v3670_v49, %v4701_v45  ;;  %v703_v58 = vpop.f32.mrb[11].mxu1  ;;  %4111 = vmatprep.subr.bf16.mxu0 %v4735_v11 }
 0x1dc   :  { %v716_v59 = vadd.f32 %v703_v58, %v4704_v46  ;;  %3690 = vmatprep.mubr.msk.f32.mxu0 %vm730_vm2, %v720_v48 }
 0x1dd   :  { %3691 = vmatmul.mubr.msk.f32.gmra.mrb[14].mxu0 %vm730_vm2, %v721_v52  ;;  %v723_v63 = vmax.f32 %v717_v53, 0.0 }
 0x1de   :  { %v722_v62 = vmax.f32 %v716_v59, 0.0  ;;  %4113 = vmatpush3.bf16.msra.mxu0 %v4735_v11 }
 0x1df   :  { %4115 = vmatprep.subr.bf16.mxu0 %v4746_v23 }
 0x1e0   :  { %3693 = vmatprep.mubr.msk.f32.mxu0 %vm730_vm2, %v722_v62 }
 0x1e1   :  { %3694 = vmatmul.mubr.msk.f32.gmra.mrb[16].mxu0 %vm730_vm2, %v723_v63  ;;  %v245_v63 = vld [vmem:[%s5181_s13 + $0x30] sm:$0xff] }
 0x1e2   :  { %4117 = vmatpush3.bf16.msra.mxu0 %v4746_v23 }
 0x2ac   :  { %v3689_v30 = vpop.f32.mrb[12].mxu0 }
 0x2ad   :  { %v815_v37 = vpop.f32.mrb[13].mxu0  ;;  %v821_v40 = vadd.f32 %v3689_v30, %v4754_v27 }
 0x2ae   :  { %v816_v39 = vadd.f32 %v4754_v27, %v815_v37 }
 0x2b0   :  { %v3692_v43 = vpop.f32.mrb[14].mxu0  ;;  %3700 = vmatprep.mubr.msk.f32.mxu1 %vm101_vm0, %v816_v39 }
 0x2b1   :  { %v825_v48 = vpop.f32.mrb[15].mxu0  ;;  %3701 = vmatmul.mubr.msk.f32.vlgmr.msra.gmra.mrb[12].mxu1 %vm101_vm0, %v821_v40  ;;  %v831_v52 = vadd.f32 %v3692_v43, %v4754_v27 }
 0x2b2   :  { %v826_v49 = vadd.f32 %v4754_v27, %v825_v48  ;;  %4101 = vmatpush3.bf16.msra.mxu1 %v4718_v1  ;;  %v4818_v48 = vpop.trf.xlu0 }
 0x2b3   :  { %4103 = vmatprep.subr.bf16.mxu1 %v4764_v41 }
 0x2b4   :  { %v3695_v53 = vpop.f32.mrb[16].mxu0  ;;  %3703 = vmatprep.mubr.msk.f32.mxu1 %vm101_vm0, %v826_v49  ;;  %v252_v49 = vld [vmem:[%s5184_s16] sm:$0xff] }
 0x2b5   :  { %v835_v58 = vpop.f32.mrb[17].mxu0  ;;  %3704 = vmatmul.mubr.msk.f32.gmra.mrb[14].mxu1 %vm101_vm0, %v831_v52  ;;  %v841_v62 = vadd.f32 %v3695_v53, %v4754_v27  ;;  %v253_v52 = vld [vmem:[%s5184_s16 + $0x8] sm:$0xff]  ;;  %v254_v53 = vld [vmem:[%s5184_s16 + $0x10] sm:$0xff] }
 0x2b6   :  { %v836_v59 = vadd.f32 %v4754_v27, %v835_v58  ;;  %4105 = vmatpush3.bf16.msra.mxu1 %v4764_v41  ;;  %v4831_v58 = vpack.c.bf16 %v253_v52, %v252_v49  ;;  %v250_v49 = vld [vmem:[%s5183_s15 + $0x10] sm:$0xff]  ;;  %v251_v52 = vld [vmem:[%s5183_s15 + $0x18] sm:$0xff] }
 0x2b8   :  { %3706 = vmatprep.mubr.msk.f32.mxu1 %vm101_vm0, %v836_v59  ;;  %v255_v59 = vld [vmem:[%s5184_s16 + $0x18] sm:$0xff]  ;;  %4135 = vmatprep.subr.bf16.mxu1 %v4831_v58 }
 0x2b9   :  { %3707 = vmatmul.mubr.msk.f32.gmra.mrb[16].mxu1 %vm101_vm0, %v841_v62  ;;  %v4836_v62 = vpack.c.bf16 %v255_v59, %v254_v53 }
 0x2ba   :  { %3717 = vmatprep.mubr.msk.f32.mxu1 %vm485_vm1, %v4626_v51 }
 0x2bd   :  { %3718 = vmatmul.mubr.msk.f32.vlgmr.msra.gmra.mrb[12].mxu1 %vm485_vm1, %v4624_v50  ;;  %v246_v50 = vld [vmem:[%s5181_s13 + $0x38] sm:$0xff] }
 0x2be   :  { %3720 = vmatprep.mubr.msk.f32.mxu1 %vm485_vm1, %v4630_v55  ;;  %v4797_v51 = vpack.c.bf16 %v246_v50, %v245_v63  ;;  %4137 = vmatpush3.bf16.msra.mxu1 %v4831_v58  ;;  %v4845_v63 = vld [vmem:[%s5182_s14] ss:$0 sm:$0xff] }
 0x2bf   :  { %4139 = vmatprep.subr.bf16.mxu1 %v4836_v62 }
 0x2c0   :  { %4119 = vmatprep.subr.bf16.mxu0 %v4797_v51 }
 0x2c1   :  { %3721 = vmatmul.mubr.msk.f32.gmra.mrb[14].mxu1 %vm485_vm1, %v4628_v54  ;;  %4121 = vmatpush3.bf16.msra.mxu0 %v4797_v51  ;;  %v4804_v54 = vld [vmem:[%s5180_s12] ss:$0 sm:$0xff] }
 0x2c2   :  { %3723 = vmatprep.mubr.msk.f32.mxu1 %vm485_vm1, %v4640_v61  ;;  %4141 = vmatpush3.bf16.msra.mxu1 %v4836_v62 }
 0x2c5   :  { %3724 = vmatmul.mubr.msk.f32.gmra.mrb[16].mxu1 %vm485_vm1, %v4638_v60 }
 0x390   :  { %v3719_v55 = vpop.f32.mrb[12].mxu1 }
 0x391   :  { %v1059_v60 = vadd.f32 %v3719_v55, %v4804_v54  ;;  %v1023_v61 = vpop.f32.mrb[13].mxu1 }
 0x392   :  { %v1058_v56 = vadd.f32 %v4804_v54, %v1023_v61 }
 0x393   :  { %v1065_v3 = vmax.f32 %v1059_v60, 0.0 }
 0x394   :  { %v1064_v57 = vmax.f32 %v1058_v56, 0.0  ;;  %v3722_v2 = vpop.f32.mrb[14].mxu1 }
 0x395   :  { %v1061_v6 = vadd.f32 %v3722_v2, %v4804_v54  ;;  %v1033_v8 = vpop.f32.mrb[15].mxu1 }
 0x396   :  { %v1060_v12 = vadd.f32 %v4804_v54, %v1033_v8  ;;  %3742 = vmatprep.mubr.msk.f32.mxu0 %vm730_vm2, %v1064_v57 }
 0x397   :  { %3743 = vmatmul.mubr.msk.f32.vlgmr.msra.gmra.mrb[18].mxu0 %vm730_vm2, %v1065_v3  ;;  %v1067_v31 = vmax.f32 %v1061_v6, 0.0 }
 0x398   :  { %v1066_v17 = vmax.f32 %v1060_v12, 0.0  ;;  %v3725_v30 = vpop.f32.mrb[16].mxu1 }
 0x399   :  { %v1063_v36 = vadd.f32 %v3725_v30, %v4804_v54  ;;  %v1043_v37 = vpop.f32.mrb[17].mxu1 }
 0x39a   :  { %v1062_v39 = vadd.f32 %v4804_v54, %v1043_v37  ;;  %3745 = vmatprep.mubr.msk.f32.mxu0 %vm730_vm2, %v1066_v17  ;;  %v4853_v37 = vpop.trf.xlu0 }
 0x39b   :  { %3746 = vmatmul.mubr.msk.f32.gmra.mrb[20].mxu0 %vm730_vm2, %v1067_v31  ;;  %v1069_v43 = vmax.f32 %v1063_v36, 0.0 }
 0x39c   :  { %v1068_v40 = vmax.f32 %v1062_v39, 0.0  ;;  %v248_v39 = vld [vmem:[%s5183_s15] sm:$0xff] }
 0x39e   :  { %3748 = vmatprep.mubr.msk.f32.mxu0 %vm730_vm2, %v1068_v40  ;;  %v249_v40 = vld [vmem:[%s5183_s15 + $0x8] sm:$0xff] }
 0x39f   :  { %3749 = vmatmul.mubr.msk.f32.gmra.mrb[22].mxu0 %vm730_vm2, %v1069_v43  ;;  %v4865_v43 = vpack.c.bf16 %v249_v40, %v248_v39 }
 0x3a0   :  { %3763 = vmatprep.mubr.msk.f32.mxu0 %vm1221_vm3, %v4818_v48 }
 0x3a1   :  { %4143 = vmatprep.subr.bf16.mxu1 %v4865_v43 }
 0x46a   :  { %v3744_v50 = vpop.f32.mrb[18].mxu0 }
 0x46b   :  { %v1166_v55 = vadd.f32 %v3744_v50, %v4845_v63  ;;  %v1160_v60 = vpop.f32.mrb[19].mxu0  ;;  %v4874_v50 = vpack.c.bf16 %v251_v52, %v250_v49 }
 0x46c   :  { %v1161_v61 = vadd.f32 %v4845_v63, %v1160_v60 }
 0x46e   :  { %v4122_v56 = vpack.c.bf16 %v1166_v55, %v1161_v61  ;;  %v3747_v57 = vpop.f32.mrb[20].mxu0 }
 0x46f   :  { %v1176_v2 = vadd.f32 %v3747_v57, %v4845_v63  ;;  %v1170_v3 = vpop.f32.mrb[21].mxu0 }
 0x470   :  { %v1171_v6 = vadd.f32 %v4845_v63, %v1170_v3  ;;  %4123 = vmatprep.subr.bf16.mxu0 %v4122_v56 }
 0x471   :  { %4125 = vmatpush3.bf16.msra.mxu0 %v4122_v56 }
 0x472   :  { %v4126_v8 = vpack.c.bf16 %v1176_v2, %v1171_v6  ;;  %v3750_v12 = vpop.f32.mrb[22].mxu0 }
 0x473   :  { %v1186_v17 = vadd.f32 %v3750_v12, %v4845_v63  ;;  %v1180_v30 = vpop.f32.mrb[23].mxu0 }
 0x474   :  { %v1181_v31 = vadd.f32 %v4845_v63, %v1180_v30  ;;  %4127 = vmatprep.subr.bf16.mxu0 %v4126_v8 }
 0x475   :  { %4129 = vmatpush3.bf16.msra.mxu0 %v4126_v8 }
 0x476   :  { %v4130_v36 = vpack.c.bf16 %v1186_v17, %v1181_v31 }
 0x478   :  { %4131 = vmatprep.subr.bf16.mxu0 %v4130_v36 }
 0x479   :  { %4133 = vmatpush3.bf16.msra.mxu0 %v4130_v36 }
 0x47c   :  { %3764 = vmatmul.mubr.msk.f32.vlgmr.msra.gmra.mrb[24].mxu0 %vm1221_vm3, %v4853_v37 }
 0x47d   :  { %3792 = vmatprep.mubr.msk.f32.mxu0 %vm101_vm0, %v4490_v13 }
 0x54f   :  { %v3765_v53 = vpop.f32.mrb[24].mxu0 }
 0x550   :  { %v1294_v59 = vpop.f32.mrb[25].mxu0 }
 0x551   :  { %3774 = vmatprep.mubr.msk.f32.mxu1 %vm485_vm1, %v1294_v59 }
 0x552   :  { %3775 = vmatmul.mubr.msk.f32.vlgmr.msra.gmra.mrb[18].mxu1 %vm485_vm1, %v3765_v53 }
 0x553   :  { %4145 = vmatpush3.bf16.msra.mxu1 %v4865_v43  ;;  %3785 = vmatprep.mubr.msk.f32.mxu1 %vm485_vm1, %v4464_v4  ;;  %v4893_v4 = vld [vmem:[%s5185_s17] ss:$0 sm:$0xff]  ;;  %s4348_s17 = smov [#allocation2]  }
 0x554   :  { %4147 = vmatprep.subr.bf16.mxu1 %v4874_v50  ;;  %s3144_s22 = sshll.u32 %s4348_s17, 4  ;;  %s3145_s22 = int_to_ptr.vmem [resolvable:$true] %s3144_s22 }
 0x555   :  { %s4324_s7 = scalar_lea.vmem %s3145_s22, 256  ;;  %p4329_p1 = scmp.lt.s32.totalorder %s3145_s22, %s3145_s22 }
 0x556   :  { %p4325_p0 = scmp.ne.s32.totalorder %s3145_s22, %s4324_s7  ;;  %p4330_p2 = scmp.lt.s32.totalorder %s4324_s7, %s4324_s7 }
 0x557   :  { %4149 = vmatpush3.bf16.msra.mxu1 %v4874_v50 }
 0x558   :  { %4159 = vmatprep.subr.bf16.mxu1 %v4571_v32  ;;  %p4331_p3 = por %p4330_p2, %p4329_p1 }
 0x55a   :  { %3786 = vmatmul.mubr.msk.f32.vlgmr.msra.gmra.mrb[18].mxu1 %vm485_vm1, %v4469_v5  ;;  %p4332_p4 = pnand %p4331_p3, %p4325_p0 }
 0x55b   :  { %4161 = vmatpush3.bf16.msra.mxu1 %v4571_v32 }
 0x55c   :  { %4163 = vmatprep.subr.bf16.mxu1 %v4581_v35 }
 0x55f   :  { %4165 = vmatpush3.bf16.msra.mxu1 %v4581_v35 }
 0x560   :  { %4167 = vmatprep.subr.bf16.mxu1 %v4591_v38 }
 0x62d   :  { %v3787_v55 = vpop.f32.mrb[18].mxu1 }
 0x62e   :  { %v4896_v60 = vadd.f32 %v3787_v55, %v4893_v4  ;;  %v1456_v61 = vpop.f32.mrb[19].mxu1 }
 0x62f   :  { %v4899_v5 = vadd.f32 %v4893_v4, %v1456_v61 }
 0x630   :  { %v1474_v56 = vmax.f32 %v4896_v60, 0.0 }
 0x631   :  { %v1473_v57 = vmax.f32 %v4899_v5, 0.0 }
 0x633   :  { %v4150_v2 = vpack.c.bf16 %v1474_v56, %v1473_v57 }
 0x635   :  { %4151 = vmatprep.subr.bf16.mxu0 %v4150_v2 }
 0x636   :  { %4153 = vmatpush3.bf16.msra.mxu0 %v4150_v2 }
 0x637   :  { %4155 = vmatprep.subr.bf16.mxu0 %v4150_v2 }
 0x639   :  { %3793 = vmatmul.mubr.msk.f32.vlgmr.msra.gmra.mrb[26].mxu0 %vm101_vm0, %v4492_v14 }
 0x63a   :  { %4157 = vmatpush3.bf16.msra.mxu0 %v4150_v2  ;;  %3795 = vmatprep.mubr.msk.f32.mxu0 %vm101_vm0, %v4494_v15 }
 0x63b   :  { %4175 = vmatprep.subr.bf16.mxu0 %v4603_v42 }
 0x63d   :  { %3796 = vmatmul.mubr.msk.f32.gmra.mrb[28].mxu0 %vm101_vm0, %v4517_v21 }
 0x63e   :  { %3798 = vmatprep.mubr.msk.f32.mxu0 %vm101_vm0, %v4521_v22 }
 0x641   :  { %3799 = vmatmul.mubr.msk.f32.gmra.mrb[30].mxu0 %vm101_vm0, %v4533_v25 }
 0x642   :  { %3805 = vmatprep.mubr.msk.f32.mxu0 %vm101_vm0, %v4479_v9 }
 0x645   :  { %3806 = vmatmul.mubr.msk.f32.vlgmr.msra.gmra.mrb[32].mxu0 %vm101_vm0, %v4507_v18 }
 0x646   :  { %3808 = vmatprep.mubr.msk.f32.mxu0 %vm101_vm0, %v4529_v24  ;;  %4177 = vmatpush3.bf16.msra.mxu0 %v4603_v42 }
 0x647   :  { %4179 = vmatprep.subr.bf16.mxu0 %v4608_v44 }
 0x649   :  { %3809 = vmatmul.mubr.msk.f32.gmra.mrb[34].mxu0 %vm101_vm0, %v4541_v26 }
 0x64a   :  { %3811 = vmatprep.mubr.msk.f32.mxu0 %vm101_vm0, %v4553_v28  ;;  %4181 = vmatpush3.bf16.msra.mxu0 %v4608_v44 }
 0x64b   :  { %4183 = vmatprep.subr.bf16.mxu0 %v4619_v47 }
 0x64d   :  { %3812 = vmatmul.mubr.msk.f32.gmra.mrb[36].mxu0 %vm101_vm0, %v4558_v29 }
 0x64e   :  { %4185 = vmatpush3.bf16.msra.mxu0 %v4619_v47 }
 0x64f   :  { %4187 = vmatprep.subr.bf16.mxu0 %v4671_v10 }
 0x652   :  { %4189 = vmatpush3.bf16.msra.mxu0 %v4671_v10 }
 0x653   :  { %4191 = vmatprep.subr.bf16.mxu0 %v4681_v16 }
 0x70c   :  { %v4938_v3 = vpop.f32.mrb[26].mxu0 }
 0x70d   :  { %v4940_v6 = vpop.f32.mrb[27].mxu0 }
 0x710   :  { %v4942_v8 = vpop.f32.mrb[28].mxu0 }
 0x711   :  { %v4944_v12 = vpop.f32.mrb[29].mxu0 }
 0x714   :  { %v4946_v17 = vpop.f32.mrb[30].mxu0 }
 0x715   :  { %v4948_v30 = vpop.f32.mrb[31].mxu0 }
 0x718   :  { %v3807_v31 = vpop.f32.mrb[32].mxu0 }
 0x719   :  { %v1636_v36 = vpop.f32.mrb[33].mxu0 }
 0x71a   :  { %3822 = vmatprep.mubr.msk.f32.mxu1 %vm485_vm1, %v1636_v36 }
 0x71b   :  { %3823 = vmatmul.mubr.msk.f32.vlgmr.msra.gmra.mrb[20].mxu1 %vm485_vm1, %v3807_v31 }
 0x71c   :  { %v3810_v39 = vpop.f32.mrb[34].mxu0  ;;  %4169 = vmatpush3.bf16.msra.mxu1 %v4591_v38 }
 0x71d   :  { %v1646_v40 = vpop.f32.mrb[35].mxu0  ;;  %4171 = vmatprep.subr.bf16.mxu1 %v4642_v0 }
 0x71e   :  { %3825 = vmatprep.mubr.msk.f32.mxu1 %vm485_vm1, %v1646_v40 }
 0x71f   :  { %3826 = vmatmul.mubr.msk.f32.gmra.mrb[22].mxu1 %vm485_vm1, %v3810_v39 }
 0x720   :  { %v3813_v49 = vpop.f32.mrb[36].mxu0  ;;  %4173 = vmatpush3.bf16.msra.mxu1 %v4642_v0 }
 0x721   :  { %v1656_v52 = vpop.f32.mrb[37].mxu0  ;;  %4203 = vmatprep.subr.bf16.mxu1 %v4730_v7 }
 0x722   :  { %3828 = vmatprep.mubr.msk.f32.mxu1 %vm485_vm1, %v1656_v52 }
 0x723   :  { %3829 = vmatmul.mubr.msk.f32.gmra.mrb[24].mxu1 %vm485_vm1, %v3813_v49 }
 0x724   :  { %3839 = vmatprep.mubr.msk.f32.mxu1 %vm485_vm1, %v4940_v6 }
 0x727   :  { %3840 = vmatmul.mubr.msk.f32.vlgmr.msra.gmra.mrb[20].mxu1 %vm485_vm1, %v4938_v3 }
 0x728   :  { %3842 = vmatprep.mubr.msk.f32.mxu1 %vm485_vm1, %v4944_v12  ;;  %4205 = vmatpush3.bf16.msra.mxu1 %v4730_v7 }
 0x729   :  { %4207 = vmatprep.subr.bf16.mxu1 %v4735_v11 }
 0x72b   :  { %3843 = vmatmul.mubr.msk.f32.gmra.mrb[22].mxu1 %vm485_vm1, %v4942_v8 }
 0x72c   :  { %3845 = vmatprep.mubr.msk.f32.mxu1 %vm485_vm1, %v4948_v30  ;;  %4209 = vmatpush3.bf16.msra.mxu1 %v4735_v11 }
 0x72d   :  { %4211 = vmatprep.subr.bf16.mxu1 %v4746_v23 }
 0x72f   :  { %3846 = vmatmul.mubr.msk.f32.gmra.mrb[24].mxu1 %vm485_vm1, %v4946_v17 }
 0x730   :  { %4213 = vmatpush3.bf16.msra.mxu1 %v4746_v23 }
 0x731   :  { %4215 = vmatprep.subr.bf16.mxu1 %v4797_v51 }
 0x734   :  { %4217 = vmatpush3.bf16.msra.mxu1 %v4797_v51 }
 0x7fa   :  { %v3841_v7 = vpop.f32.mrb[20].mxu1 }
 0x7fb   :  { %v1892_v53 = vadd.f32 %v3841_v7, %v4688_v19  ;;  %v1862_v59 = vpop.f32.mrb[21].mxu1 }
 0x7fc   :  { %v1891_v55 = vadd.f32 %v1862_v59, %v4690_v20 }
 0x7fd   :  { %v1898_v11 = vmax.f32 %v1892_v53, 0.0 }
 0x7fe   :  { %v1897_v61 = vmax.f32 %v1891_v55, 0.0  ;;  %v3844_v2 = vpop.f32.mrb[22].mxu1 }
 0x7ff   :  { %v1894_v31 = vadd.f32 %v3844_v2, %v4694_v33  ;;  %v1872_v36 = vpop.f32.mrb[23].mxu1 }
 0x800   :  { %v1893_v39 = vadd.f32 %v1872_v36, %v4696_v34  ;;  %3864 = vmatprep.mubr.msk.f32.mxu0 %vm730_vm2, %v1897_v61 }
 0x801   :  { %3865 = vmatmul.mubr.msk.f32.vlgmr.msra.gmra.mrb[38].mxu0 %vm730_vm2, %v1898_v11  ;;  %v1900_v40 = vmax.f32 %v1894_v31, 0.0 }
 0x802   :  { %v1899_v23 = vmax.f32 %v1893_v39, 0.0  ;;  %v3847_v51 = vpop.f32.mrb[24].mxu1  ;;  %4193 = vmatpush3.bf16.msra.mxu0 %v4681_v16 }
 0x803   :  { %v1896_v49 = vadd.f32 %v3847_v51, %v4701_v45  ;;  %v1882_v52 = vpop.f32.mrb[25].mxu1  ;;  %4195 = vmatprep.subr.bf16.mxu0 %v4718_v1 }
 0x804   :  { %v1895_v7 = vadd.f32 %v1882_v52, %v4704_v46  ;;  %3867 = vmatprep.mubr.msk.f32.mxu0 %vm730_vm2, %v1899_v23 }
 0x805   :  { %3868 = vmatmul.mubr.msk.f32.gmra.mrb[40].mxu0 %vm730_vm2, %v1900_v40  ;;  %v1902_v59 = vmax.f32 %v1896_v49, 0.0 }
 0x806   :  { %v1901_v53 = vmax.f32 %v1895_v7, 0.0 }
 0x808   :  { %3870 = vmatprep.mubr.msk.f32.mxu0 %vm730_vm2, %v1901_v53 }
 0x809   :  { %3871 = vmatmul.mubr.msk.f32.gmra.mrb[42].mxu0 %vm730_vm2, %v1902_v59 }
 0x8d4   :  { %v3866_v55 = vpop.f32.mrb[38].mxu0 }
 0x8d5   :  { %v1987_v16 = vpop.f32.mrb[39].mxu0  ;;  %v1993_v2 = vadd.f32 %v3866_v55, %v4754_v27 }
 0x8d6   :  { %v1988_v61 = vadd.f32 %v4754_v27, %v1987_v16 }
 0x8d8   :  { %v3869_v11 = vpop.f32.mrb[40].mxu0  ;;  %3877 = vmatprep.mubr.msk.f32.mxu0 %vm101_vm0, %v1988_v61 }
 0x8d9   :  { %v1997_v31 = vpop.f32.mrb[41].mxu0  ;;  %3878 = vmatmul.mubr.msk.f32.vlgmr.msra.gmra.mrb[44].mxu0 %vm101_vm0, %v1993_v2  ;;  %v2003_v39 = vadd.f32 %v3869_v11, %v4754_v27 }
 0x8da   :  { %v1998_v36 = vadd.f32 %v4754_v27, %v1997_v31  ;;  %4197 = vmatpush3.bf16.msra.mxu0 %v4718_v1 }
 0x8db   :  { %4199 = vmatprep.subr.bf16.mxu0 %v4764_v41 }
 0x8dc   :  { %v3872_v23 = vpop.f32.mrb[42].mxu0  ;;  %3880 = vmatprep.mubr.msk.f32.mxu0 %vm101_vm0, %v1998_v36 }
 0x8dd   :  { %v2007_v51 = vpop.f32.mrb[43].mxu0  ;;  %3881 = vmatmul.mubr.msk.f32.gmra.mrb[46].mxu0 %vm101_vm0, %v2003_v39  ;;  %v2013_v49 = vadd.f32 %v3872_v23, %v4754_v27 }
 0x8de   :  { %v2008_v40 = vadd.f32 %v4754_v27, %v2007_v51  ;;  %4201 = vmatpush3.bf16.msra.mxu0 %v4764_v41 }
 0x8df   :  { %4231 = vmatprep.subr.bf16.mxu0 %v4831_v58 }
 0x8e0   :  { %3883 = vmatprep.mubr.msk.f32.mxu0 %vm101_vm0, %v2008_v40 }
 0x8e1   :  { %3884 = vmatmul.mubr.msk.f32.gmra.mrb[48].mxu0 %vm101_vm0, %v2013_v49 }
 0x8e2   :  { %3894 = vmatprep.mubr.msk.f32.mxu0 %vm485_vm1, %v4940_v6 }
 0x8e5   :  { %3895 = vmatmul.mubr.msk.f32.vlgmr.msra.gmra.mrb[44].mxu0 %vm485_vm1, %v4938_v3 }
 0x8e6   :  { %3897 = vmatprep.mubr.msk.f32.mxu0 %vm485_vm1, %v4944_v12  ;;  %4233 = vmatpush3.bf16.msra.mxu0 %v4831_v58 }
 0x8e7   :  { %4235 = vmatprep.subr.bf16.mxu0 %v4836_v62 }
 0x8e9   :  { %3898 = vmatmul.mubr.msk.f32.gmra.mrb[46].mxu0 %vm485_vm1, %v4942_v8 }
 0x8ea   :  { %3900 = vmatprep.mubr.msk.f32.mxu0 %vm485_vm1, %v4948_v30  ;;  %4237 = vmatpush3.bf16.msra.mxu0 %v4836_v62 }
 0x8eb   :  { %4239 = vmatprep.subr.bf16.mxu0 %v4865_v43 }
 0x8ed   :  { %3901 = vmatmul.mubr.msk.f32.gmra.mrb[48].mxu0 %vm485_vm1, %v4946_v17 }
 0x9b8   :  { %v3896_v1 = vpop.f32.mrb[44].mxu0 }
 0x9b9   :  { %v2225_v41 = vadd.f32 %v3896_v1, %v4804_v54  ;;  %v2195_v3 = vpop.f32.mrb[45].mxu0 }
 0x9ba   :  { %v2224_v58 = vadd.f32 %v4804_v54, %v2195_v3 }
 0x9bb   :  { %v2231_v52 = vmax.f32 %v2225_v41, 0.0 }
 0x9bc   :  { %v2230_v6 = vmax.f32 %v2224_v58, 0.0  ;;  %v3899_v12 = vpop.f32.mrb[46].mxu0 }
 0x9bd   :  { %v2227_v8 = vadd.f32 %v3899_v12, %v4804_v54  ;;  %v2205_v7 = vpop.f32.mrb[47].mxu0 }
 0x9be   :  { %v2226_v30 = vadd.f32 %v4804_v54, %v2205_v7  ;;  %3919 = vmatprep.mubr.msk.f32.mxu1 %vm730_vm2, %v2230_v6 }
 0x9bf   :  { %3920 = vmatmul.mubr.msk.f32.vlgmr.msra.gmra.mrb[26].mxu1 %vm730_vm2, %v2231_v52  ;;  %v2233_v53 = vmax.f32 %v2227_v8, 0.0 }
 0x9c0   :  { %v2232_v62 = vmax.f32 %v2226_v30, 0.0  ;;  %v3902_v17 = vpop.f32.mrb[48].mxu0 }
 0x9c1   :  { %v2229_v59 = vadd.f32 %v3902_v17, %v4804_v54  ;;  %v2215_v55 = vpop.f32.mrb[49].mxu0 }
 0x9c2   :  { %v2228_v16 = vadd.f32 %v4804_v54, %v2215_v55  ;;  %3922 = vmatprep.mubr.msk.f32.mxu1 %vm730_vm2, %v2232_v62 }
 0x9c3   :  { %3923 = vmatmul.mubr.msk.f32.gmra.mrb[28].mxu1 %vm730_vm2, %v2233_v53  ;;  %v2235_v2 = vmax.f32 %v2229_v59, 0.0 }
 0x9c4   :  { %v2234_v61 = vmax.f32 %v2228_v16, 0.0 }
 0x9c6   :  { %3925 = vmatprep.mubr.msk.f32.mxu1 %vm730_vm2, %v2234_v61 }
 0x9c7   :  { %3926 = vmatmul.mubr.msk.f32.gmra.mrb[30].mxu1 %vm730_vm2, %v2235_v2 }
 0x9c8   :  { %3940 = vmatprep.mubr.msk.f32.mxu1 %vm1221_vm3, %v4818_v48 }
 0xa92   :  { %v3921_v11 = vpop.f32.mrb[26].mxu1 }
 0xa93   :  { %v2326_v31 = vadd.f32 %v3921_v11, %v4845_v63  ;;  %v2320_v36 = vpop.f32.mrb[27].mxu1 }
 0xa94   :  { %v2321_v39 = vadd.f32 %v4845_v63, %v2320_v36 }
 0xa96   :  { %v4218_v54 = vpack.c.bf16 %v2326_v31, %v2321_v39  ;;  %v3924_v23 = vpop.f32.mrb[28].mxu1 }
 0xa97   :  { %v2336_v51 = vadd.f32 %v3924_v23, %v4845_v63  ;;  %v2330_v40 = vpop.f32.mrb[29].mxu1 }
 0xa98   :  { %v2331_v49 = vadd.f32 %v4845_v63, %v2330_v40  ;;  %4219 = vmatprep.subr.bf16.mxu1 %v4218_v54 }
 0xa99   :  { %4221 = vmatpush3.bf16.msra.mxu1 %v4218_v54 }
 0xa9a   :  { %v4222_v1 = vpack.c.bf16 %v2336_v51, %v2331_v49  ;;  %v3927_v41 = vpop.f32.mrb[30].mxu1 }
 0xa9b   :  { %v2346_v3 = vadd.f32 %v3927_v41, %v4845_v63  ;;  %v2340_v48 = vpop.f32.mrb[31].mxu1 }
 0xa9c   :  { %v2341_v58 = vadd.f32 %v4845_v63, %v2340_v48  ;;  %4223 = vmatprep.subr.bf16.mxu1 %v4222_v1 }
 0xa9d   :  { %4225 = vmatpush3.bf16.msra.mxu1 %v4222_v1 }
 0xa9e   :  { %v4226_v6 = vpack.c.bf16 %v2346_v3, %v2341_v58 }
 0xaa0   :  { %4227 = vmatprep.subr.bf16.mxu1 %v4226_v6 }
 0xaa1   :  { %4229 = vmatpush3.bf16.msra.mxu1 %v4226_v6 }
 0xaa4   :  { %3941 = vmatmul.mubr.msk.f32.vlgmr.msra.gmra.mrb[32].mxu1 %vm1221_vm3, %v4853_v37 }
 0xaa5   :  { %3969 = vmatprep.mubr.msk.f32.mxu1 %vm101_vm0, %v4490_v13 }
 0xb77   :  { %v3942_v12 = vpop.f32.mrb[32].mxu1 }
 0xb78   :  { %v2415_v52 = vpop.f32.mrb[33].mxu1 }
 0xb79   :  { %3951 = vmatprep.mubr.msk.f32.mxu0 %vm485_vm1, %v2415_v52 }
 0xb7a   :  { %3952 = vmatmul.mubr.msk.f32.vlgmr.msra.gmra.mrb[50].mxu0 %vm485_vm1, %v3942_v12 }
 0xb7b   :  { %4241 = vmatpush3.bf16.msra.mxu0 %v4865_v43  ;;  %3962 = vmatprep.mubr.msk.f32.mxu0 %vm485_vm1, %v1473_v57 }
 0xb7c   :  { %4243 = vmatprep.subr.bf16.mxu0 %v4874_v50 }
 0xb7f   :  { %4245 = vmatpush3.bf16.msra.mxu0 %v4874_v50 }
 0xb80   :  { %4255 = vmatprep.subr.bf16.mxu0 %v4571_v32 }
 0xb82   :  { %3963 = vmatmul.mubr.msk.f32.vlgmr.msra.gmra.mrb[50].mxu0 %vm485_vm1, %v1474_v56 }
 0xb83   :  { %4257 = vmatpush3.bf16.msra.mxu0 %v4571_v32 }
 0xb84   :  { %4259 = vmatprep.subr.bf16.mxu0 %v4581_v35 }
 0xb87   :  { %4261 = vmatpush3.bf16.msra.mxu0 %v4581_v35 }
 0xb88   :  { %4263 = vmatprep.subr.bf16.mxu0 %v4591_v38 }
 0xc55   :  { %v3964_v13 = vpop.f32.mrb[50].mxu0 }
 0xc56   :  { %v2587_v63 = vadd.f32 %v3964_v13, %v4893_v4  ;;  %v2577_v37 = vpop.f32.mrb[51].mxu0 }
 0xc57   :  { %v2586_v43 = vadd.f32 %v4893_v4, %v2577_v37 }
 0xc58   :  { %v2589_v50 = vmax.f32 %v2587_v63, 0.0 }
 0xc59   :  { %v2588_v5 = vmax.f32 %v2586_v43, 0.0 }
 0xc5a   :  { %3132 = vst.msk [vmem:[#allocation2 + $0x8] sm:$0xff] %vm485_vm1, %v2589_v50 }
 0xc5b   :  { %v4246_v60 = vpack.c.bf16 %v2589_v50, %v2588_v5  ;;  %3131 = vst.msk [vmem:[#allocation2] sm:$0xff] %vm485_vm1, %v2588_v5 }
 0xc5d   :  { %4247 = vmatprep.subr.bf16.mxu1 %v4246_v60 }
 0xc5e   :  { %4249 = vmatpush3.bf16.msra.mxu1 %v4246_v60 }
 0xc5f   :  { %4251 = vmatprep.subr.bf16.mxu1 %v4246_v60 }
 0xc61   :  { %3970 = vmatmul.mubr.msk.f32.vlgmr.msra.gmra.mrb[34].mxu1 %vm101_vm0, %v4492_v14 }
 0xc62   :  { %4253 = vmatpush3.bf16.msra.mxu1 %v4246_v60  ;;  %3972 = vmatprep.mubr.msk.f32.mxu1 %vm101_vm0, %v4494_v15 }
 0xc63   :  { %4271 = vmatprep.subr.bf16.mxu1 %v4603_v42 }
 0xc65   :  { %3973 = vmatmul.mubr.msk.f32.gmra.mrb[36].mxu1 %vm101_vm0, %v4517_v21 }
 0xc66   :  { %3975 = vmatprep.mubr.msk.f32.mxu1 %vm101_vm0, %v4521_v22 }
 0xc69   :  { %3976 = vmatmul.mubr.msk.f32.gmra.mrb[38].mxu1 %vm101_vm0, %v4533_v25 }
 0xc6a   :  { %3982 = vmatprep.mubr.msk.f32.mxu1 %vm101_vm0, %v4479_v9 }
 0xc6d   :  { %3983 = vmatmul.mubr.msk.f32.vlgmr.msra.gmra.mrb[40].mxu1 %vm101_vm0, %v4507_v18 }
 0xc6e   :  { %3985 = vmatprep.mubr.msk.f32.mxu1 %vm101_vm0, %v4529_v24  ;;  %4273 = vmatpush3.bf16.msra.mxu1 %v4603_v42 }
 0xc6f   :  { %4275 = vmatprep.subr.bf16.mxu1 %v4608_v44 }
 0xc71   :  { %3986 = vmatmul.mubr.msk.f32.gmra.mrb[42].mxu1 %vm101_vm0, %v4541_v26 }
 0xc72   :  { %3988 = vmatprep.mubr.msk.f32.mxu1 %vm101_vm0, %v4553_v28  ;;  %4277 = vmatpush3.bf16.msra.mxu1 %v4608_v44 }
 0xc73   :  { %4279 = vmatprep.subr.bf16.mxu1 %v4619_v47 }
 0xc75   :  { %3989 = vmatmul.mubr.msk.f32.gmra.mrb[44].mxu1 %vm101_vm0, %v4558_v29 }
 0xc76   :  { %4281 = vmatpush3.bf16.msra.mxu1 %v4619_v47 }
 0xc77   :  { %4283 = vmatprep.subr.bf16.mxu1 %v4671_v10 }
 0xc7a   :  { %4285 = vmatpush3.bf16.msra.mxu1 %v4671_v10 }
 0xd34   :  { %v3971_v9 = vpop.f32.mrb[34].mxu1 }
 0xd35   :  { %v2656_v14 = vpop.f32.mrb[35].mxu1 }
 0xd38   :  { %v3974_v15 = vpop.f32.mrb[36].mxu1 }
 0xd39   :  { %v2666_v18 = vpop.f32.mrb[37].mxu1 }
 0xd3c   :  { %v3977_v21 = vpop.f32.mrb[38].mxu1 }
 0xd3d   :  { %v2676_v22 = vpop.f32.mrb[39].mxu1 }
 0xd40   :  { %v3984_v24 = vpop.f32.mrb[40].mxu1 }
 0xd41   :  { %v2751_v25 = vpop.f32.mrb[41].mxu1 }
 0xd42   :  { %3999 = vmatprep.mubr.msk.f32.mxu0 %vm485_vm1, %v2751_v25 }
 0xd43   :  { %4000 = vmatmul.mubr.msk.f32.vlgmr.msra.gmra.mrb[52].mxu0 %vm485_vm1, %v3984_v24 }
 0xd44   :  { %v3987_v26 = vpop.f32.mrb[42].mxu1  ;;  %4265 = vmatpush3.bf16.msra.mxu0 %v4591_v38 }
 0xd45   :  { %v2761_v28 = vpop.f32.mrb[43].mxu1  ;;  %4267 = vmatprep.subr.bf16.mxu0 %v4642_v0 }
 0xd46   :  { %4002 = vmatprep.mubr.msk.f32.mxu0 %vm485_vm1, %v2761_v28 }
 0xd47   :  { %4003 = vmatmul.mubr.msk.f32.gmra.mrb[54].mxu0 %vm485_vm1, %v3987_v26 }
 0xd48   :  { %v3990_v29 = vpop.f32.mrb[44].mxu1  ;;  %4269 = vmatpush3.bf16.msra.mxu0 %v4642_v0 }
 0xd49   :  { %v2771_v32 = vpop.f32.mrb[45].mxu1 }
 0xd4a   :  { %4005 = vmatprep.mubr.msk.f32.mxu0 %vm485_vm1, %v2771_v32 }
 0xd4b   :  { %4006 = vmatmul.mubr.msk.f32.gmra.mrb[56].mxu0 %vm485_vm1, %v3990_v29 }
 0xd4c   :  { %4016 = vmatprep.mubr.msk.f32.mxu0 %vm485_vm1, %v2656_v14 }
 0xd4f   :  { %4017 = vmatmul.mubr.msk.f32.vlgmr.msra.gmra.mrb[52].mxu0 %vm485_vm1, %v3971_v9 }
 0xd50   :  { %4019 = vmatprep.mubr.msk.f32.mxu0 %vm485_vm1, %v2666_v18 }
 0xd53   :  { %4020 = vmatmul.mubr.msk.f32.gmra.mrb[54].mxu0 %vm485_vm1, %v3974_v15 }
 0xd54   :  { %4022 = vmatprep.mubr.msk.f32.mxu0 %vm485_vm1, %v2676_v22 }
 0xd57   :  { %4023 = vmatmul.mubr.msk.f32.gmra.mrb[56].mxu0 %vm485_vm1, %v3977_v21 }
 0xe22   :  { %v4018_v35 = vpop.f32.mrb[52].mxu0 }
 0xe23   :  { %v3007_v38 = vadd.f32 %v4018_v35, %v4688_v19  ;;  %v2977_v42 = vpop.f32.mrb[53].mxu0 }
 0xe24   :  { %v3006_v44 = vadd.f32 %v2977_v42, %v4690_v20 }
 0xe25   :  { %v3013_v10 = vmax.f32 %v3007_v38, 0.0 }
 0xe26   :  { %v3012_v47 = vmax.f32 %v3006_v44, 0.0  ;;  %v4021_v0 = vpop.f32.mrb[54].mxu0 }
 0xe27   :  { %v3009_v4 = vadd.f32 %v4021_v0, %v4694_v33  ;;  %v2987_v56 = vpop.f32.mrb[55].mxu0 }
 0xe28   :  { %v3008_v57 = vadd.f32 %v2987_v56, %v4696_v34  ;;  %4041 = vmatprep.mubr.msk.f32.mxu1 %vm730_vm2, %v3012_v47 }
 0xe29   :  { %4042 = vmatmul.mubr.msk.f32.vlgmr.msra.gmra.mrb[46].mxu1 %vm730_vm2, %v3013_v10  ;;  %v3015_v30 = vmax.f32 %v3009_v4, 0.0 }
 0xe2a   :  { %v3014_v8 = vmax.f32 %v3008_v57, 0.0  ;;  %v4024_v7 = vpop.f32.mrb[56].mxu0 }
 0xe2b   :  { %v3011_v19 = vadd.f32 %v4024_v7, %v4701_v45  ;;  %v2997_v62 = vpop.f32.mrb[57].mxu0 }
 0xe2c   :  { %v3010_v20 = vadd.f32 %v2997_v62, %v4704_v46  ;;  %4044 = vmatprep.mubr.msk.f32.mxu1 %vm730_vm2, %v3014_v8 }
 0xe2d   :  { %4045 = vmatmul.mubr.msk.f32.gmra.mrb[48].mxu1 %vm730_vm2, %v3015_v30  ;;  %v3017_v17 = vmax.f32 %v3011_v19, 0.0 }
 0xe2e   :  { %v3016_v33 = vmax.f32 %v3010_v20, 0.0 }
 0xe30   :  { %4047 = vmatprep.mubr.msk.f32.mxu1 %vm730_vm2, %v3016_v33 }
 0xe31   :  { %4048 = vmatmul.mubr.msk.f32.gmra.mrb[50].mxu1 %vm730_vm2, %v3017_v17 }
 0xe32   :  { %4335 = shalt.err (!%p4332_p4)
}
 0xe33   :  { %s4336_s11 = scalar_lea.hbm %s5186_s18, 256 }
 0xe34   :  { %p4337_p5 = scmp.ne.s32.totalorder %s5186_s18, %s4336_s11  ;;  %p4340_p6 = scmp.lt.u32.totalorder %s4336_s11, %s5186_s18 }
 0xe36   :  { %p4342_p7 = pnand %p4340_p6, %p4337_p5 }
 0xe38   :  { %4345 = shalt.err (!%p4342_p7)
}
 0xe39   :  { %s4349_s13 = smov 128   ;;  %s4350_s3 = smov 8  }
 0xe3a   :  { %3150 = dma.vmem_to_hbm [thread:$0]  %s3145_s22, 256, %s5186_s18, [#allocation3], %s4349_s13, %s4349_s13, %s4350_s3  }
 0xefc   :  { %v4043_v34 = vpop.f32.mrb[46].mxu1 }
 0xefd   :  { %v3108_v45 = vadd.f32 %v4043_v34, %v4754_v27  ;;  %v3102_v46 = vpop.f32.mrb[47].mxu1 }
 0xefe   :  { %v3103_v53 = vadd.f32 %v4754_v27, %v3102_v46 }
 0xeff   :  { %3134 = vst.msk [vmem:[%s5187_s19 + $0x8] sm:$0xff] %vm101_vm0, %v3108_v45 }
 0xf00   :  { %3133 = vst.msk [vmem:[%s5187_s19] sm:$0xff] %vm101_vm0, %v3103_v53  ;;  %v4046_v59 = vpop.f32.mrb[48].mxu1 }
 0xf01   :  { %v3118_v55 = vadd.f32 %v4046_v59, %v4754_v27  ;;  %v3112_v16 = vpop.f32.mrb[49].mxu1 }
 0xf02   :  { %v3113_v61 = vadd.f32 %v4754_v27, %v3112_v16 }
 0xf03   :  { %3136 = vst.msk [vmem:[%s5187_s19 + $0x18] sm:$0xff] %vm101_vm0, %v3118_v55 }
 0xf04   :  { %3135 = vst.msk [vmem:[%s5187_s19 + $0x10] sm:$0xff] %vm101_vm0, %v3113_v61  ;;  %v4049_v2 = vpop.f32.mrb[50].mxu1 }
 0xf05   :  { %v3128_v11 = vadd.f32 %v4049_v2, %v4754_v27  ;;  %v3122_v31 = vpop.f32.mrb[51].mxu1 }
 0xf06   :  { %v3123_v36 = vadd.f32 %v4754_v27, %v3122_v31 }
 0xf07   :  { %3138 = vst.msk [vmem:[%s5187_s19 + $0x28] sm:$0xff] %vm101_vm0, %v3128_v11 }
 0xf08   :  { %3137 = vst.msk [vmem:[%s5187_s19 + $0x20] sm:$0xff] %vm101_vm0, %v3123_v36 }
 0xf09   :  { %4346 = dma.done.wait [#allocation3], 256  }
 0xf0a   :  { %4347 = vsyncadd [#allocation3], 4294967040 }
 0xf0b   :  { %3158 = vsyncpa [#allocation3], 1 }

</bundles_post_ra>
